<compile_context>
chip_gen: v5e
topology: v5e:2x2
jax: 0.10.0
libtpu: 0.0.40
codegen_flags: <defaults>
</compile_context>

<pallas_src>
import functools

import jax
import jax.numpy as jnp
from jax import lax
from jax.experimental import pallas as pl
from jax.experimental.pallas import tpu as pltpu


def _round_up(x, m):
    return ((x + m - 1) // m) * m


def _fast_recip(x):
    # EUP approx reciprocal + one Newton refinement -> ~f32-exact, no VPU divide.
    r = pl.reciprocal(x, approx=True)
    return r * (2.0 - x * r)


def _pick_vmem_limit_bytes():
    """Generation-aware scoped-VMEM limit."""
    default = 32 * 1024 * 1024
    try:
        info = pltpu.get_tpu_info()
    except Exception:
        return default
    cap = getattr(info, "vmem_capacity_bytes", None)
    if cap is None:
        return default
    if cap <= 80 * 1024 * 1024:                   # v7x-class: 64 MiB physical per TC
        return min(44 * 1024 * 1024, (7 * cap) // 10)
    return 64 * 1024 * 1024                        # v5e/v6e: 128 MiB physical


def _choose_tile_n(N, D, Kp, itemsize, vmem_limit):
    """Large N tile, but with enough grid steps to feed 2 TCs (v7x) and fit VMEM."""
    MIN_STEPS = 4                                  # ~2 steps per TensorCore on v7x; harmless on 1-TC chips
    tn = _round_up(pl.cdiv(N, MIN_STEPS), 8)
    # per-step double-buffered footprint: x tile (tn, D) + q tile (tn, Kp) in f32
    row_bytes = itemsize * D + 4 * Kp
    # resident centroid + cc blocks; assume worst case (double-buffered) in case the
    # single-buffer request is rejected by this JAX version.
    resident = 2 * (itemsize * D * Kp + 4 * Kp)
    budget = max((3 * vmem_limit) // 4 - resident, 1 << 20)
    cap = max((budget // (2 * row_bytes)) // 8 * 8, 8)
    tn = max(8, min(tn, 4096, cap, _round_up(N, 8)))
    return tn


def _clustering_kernel(x_ref, ct_ref, cc_ref, q_ref, *, alpha, n_clusters, mask_cols):
    # x_ref : (tn, D)  tile of samples
    # ct_ref: (D, Kp)  pre-transposed (padded) centroid matrix, resident across the grid
    # cc_ref: (1, Kp)  precomputed ||c||^2 (padded columns hold a huge finite value)
    # q_ref : (tn, Kp) lane-dense output tile
    x = x_ref[...]
    ct = ct_ref[...]
    if x.dtype != ct.dtype:                        # defensive; wrapper keeps them equal
        x = x.astype(jnp.float32)
        ct = ct.astype(jnp.float32)

    # Cross term on the MXU: canonical (tn, D) x (D, Kp) -> (tn, Kp); no transpose of the
    # resident block inside the grid loop.
    cross = lax.dot_general(
        x, ct,
        dimension_numbers=(((1,), (0,)), ((), ())),
        preferred_element_type=jnp.float32,
    )

    x32 = x.astype(jnp.float32)
    xx = jnp.sum(x32 * x32, axis=1, keepdims=True)           # (tn, 1)
    cc = cc_ref[...]                                          # (1, Kp)

    dist = jnp.maximum(xx + cc - 2.0 * cross, 0.0)            # expansion is >= 0 exactly
    base = 1.0 + dist * (1.0 / alpha)

    exponent = (alpha + 1.0) / 2.0                            # specialized at trace time
    if exponent == 1.0:                                       # DEC default: alpha = 1.0
        q = _fast_recip(base)
    elif float(exponent).is_integer() and 1.0 < exponent <= 8.0:
        r = _fast_recip(base)
        q = r
        for _ in range(int(exponent) - 1):
            q = q * r
    else:
        # generic fallback: 2 EUP ops, no reciprocal/Newton/pow chain
        q = jnp.exp((-exponent) * jnp.log(base))

    if mask_cols:
        # only taken for exotic tiny exponents where the huge-||c||^2 trick could leak
        col = lax.broadcasted_iota(jnp.int32, q.shape, dimension=1)
        q = jnp.where(col < n_clusters, q, 0.0)

    denom = jnp.sum(q, axis=1, keepdims=True)
    q_ref[...] = (q * _fast_recip(denom)).astype(q_ref.dtype)


def clustering_layer_forward(enc_hidden, cluster_weights, alpha=1.0, *, tn=None, mxu_dtype=None):
    """Soft cluster assignment q with shape (n_samples, n_clusters).

    mxu_dtype: optional dtype (e.g. jnp.bfloat16) to feed the MXU / narrow the x read.
               Default keeps the input precision (f32) for exact-to-tolerance results.
    """
    N, D = enc_hidden.shape
    K, D2 = cluster_weights.shape
    assert D == D2, "feature dims must match"

    compute_dtype = (jnp.dtype(mxu_dtype) if mxu_dtype is not None
                     else jnp.promote_types(enc_hidden.dtype, cluster_weights.dtype))
    x = enc_hidden.astype(compute_dtype)
    c = cluster_weights.astype(compute_dtype)

    Kp = _round_up(K, 128)                        # lane-dense output / q math
    exponent = (float(alpha) + 1.0) / 2.0
    mask_cols = (Kp != K) and (exponent < 0.5)

    # Centroids transposed ONCE in the wrapper to (D, Kp); zero-padded columns.
    ct = c.T
    if Kp != K:
        ct = jnp.pad(ct, ((0, 0), (0, Kp - K)))

    # ||c||^2 hoisted out of the per-tile loop; padded entries get a huge finite distance
    # so padded columns contribute ~0 to the normalizer with no in-kernel mask.
    cc = jnp.sum(c.astype(jnp.float32) ** 2, axis=1)          # (K,)
    if Kp != K:
        pad_val = 0.0 if mask_cols else 1e30
        cc = jnp.pad(cc, (0, Kp - K), constant_values=pad_val)
    cc = cc[None, :]                                           # (1, Kp)

    itemsize = jnp.dtype(compute_dtype).itemsize
    vmem_limit = _pick_vmem_limit_bytes()
    if tn is None:
        tn = _choose_tile_n(N, D, Kp, itemsize, vmem_limit)
    tn = max(8, (int(tn) // 8) * 8)

    grid = (pl.cdiv(N, tn),)                                   # no N padding: Pallas clips the last block

    kernel = functools.partial(_clustering_kernel, alpha=float(alpha),
                               n_clusters=K, mask_cols=mask_cols)

    cost = pl.CostEstimate(
        flops=2 * N * Kp * D,
        transcendentals=2 * N * Kp,
        bytes_accessed=itemsize * (N * D + D * Kp) + 4 * (N * Kp + Kp),
    )

    def _call(single_buffer_resident):
        resident_kw = {}
        if single_buffer_resident and hasattr(pl, "Buffered"):
            # constant-index resident blocks don't need double buffering
            resident_kw = dict(pipeline_mode=pl.Buffered(1))
        in_specs = [
            pl.BlockSpec((tn, D), lambda i: (i, 0)),            # samples, tiled over N
            pl.BlockSpec((D, Kp), lambda i: (0, 0), **resident_kw),   # centroids^T, resident
            pl.BlockSpec((1, Kp), lambda i: (0, 0), **resident_kw),   # ||c||^2, resident
        ]
        out_spec = pl.BlockSpec((tn, Kp), lambda i: (i, 0))
        return pl.pallas_call(
            kernel,
            out_shape=jax.ShapeDtypeStruct((N, Kp), jnp.float32),
            grid_spec=pltpu.PrefetchScalarGridSpec(
                num_scalar_prefetch=0,
                grid=grid,
                in_specs=in_specs,
                out_specs=out_spec,
            ),
            compiler_params=pltpu.CompilerParams(
                dimension_semantics=("parallel",),
                vmem_limit_bytes=vmem_limit,
            ),
            cost_estimate=cost,
        )(x, ct, cc)

    try:
        q_pad = _call(True)
    except Exception:
        # this JAX build rejected Buffered(1) on a top-level BlockSpec -> default buffering
        q_pad = _call(False)

    return q_pad if Kp == K else q_pad[:, :K]


def init_cluster_weights(key, n_clusters, enc_hid_dim):
    # xavier_normal_: std = sqrt(2 / (fan_in + fan_out)) = sqrt(2 / (enc_hid_dim + n_clusters))
    std = (2.0 / (n_clusters + enc_hid_dim)) ** 0.5
    return std * jax.random.normal(key, (n_clusters, enc_hid_dim), dtype=jnp.float32)


if __name__ == "__main__":
    key = jax.random.PRNGKey(0)
    k_x, k_w = jax.random.split(key)

    n_samples, enc_hid_dim, n_clusters = 8, 32, 4
    alpha = 1.0

    enc_hidden = jax.random.normal(k_x, (n_samples, enc_hid_dim), dtype=jnp.float32)
    cluster_weights = init_cluster_weights(k_w, n_clusters, enc_hid_dim)

    q = clustering_layer_forward(enc_hidden, cluster_weights, alpha=alpha)
    q = jax.block_until_ready(q)

    # pure-JAX reference (same math as the PyTorch forward)
    dist_ref = jnp.sum((enc_hidden[:, None, :] - cluster_weights[None, :, :]) ** 2, axis=2)
    q_ref = 1.0 / (1.0 + dist_ref / alpha)
    q_ref = q_ref ** ((alpha + 1.0) / 2.0)
    q_ref = q_ref / jnp.sum(q_ref, axis=1, keepdims=True)

    assert q.shape == (n_samples, n_clusters)
    assert jnp.allclose(q, q_ref, atol=1e-5, rtol=1e-5), float(jnp.max(jnp.abs(q - q_ref)))
    assert jnp.allclose(jnp.sum(q, axis=1), 1.0, atol=1e-5)

    print("KERNEL_OK")
</pallas_src>

<mosaic_0001>
module attributes {stable_mosaic.version = 11 : i64} {
  func.func @_clustering_kernel(%arg0: i32, %arg1: memref<8x32xf32, #tpu.memory_space<vmem>>, %arg2: memref<32x128xf32, #tpu.memory_space<vmem>>, %arg3: memref<1x128xf32, #tpu.memory_space<vmem>>, %arg4: memref<8x128xf32, #tpu.memory_space<vmem>>) attributes {dimension_semantics = [#tpu.dimension_semantics<parallel>], iteration_bounds = array<i64: 1>, scalar_prefetch = 0 : i64, scratch_operands = 0 : i64, tpu.core_type = #tpu.core_type<tc>, window_params = [{transform_indices = @transform_0, window_bounds = array<i64: 8, 32>}, {pipeline_mode = #tpu.pipeline_mode<synchronous>, transform_indices = @transform_1, window_bounds = array<i64: 32, 128>}, {pipeline_mode = #tpu.pipeline_mode<synchronous>, transform_indices = @transform_2, window_bounds = array<i64: 1, 128>}, {transform_indices = @transform_3, window_bounds = array<i64: 8, 128>}]} {
    %c0 = arith.constant 0 : index
    %c0_0 = arith.constant 0 : index
    %0 = vector.load %arg1[%c0, %c0_0] : memref<8x32xf32, #tpu.memory_space<vmem>>, vector<8x32xf32>
    %c0_1 = arith.constant 0 : index
    %c0_2 = arith.constant 0 : index
    %1 = vector.load %arg2[%c0_1, %c0_2] : memref<32x128xf32, #tpu.memory_space<vmem>>, vector<32x128xf32>
    %cst = arith.constant dense<0.000000e+00> : vector<8x128xf32>
    %2 = tpu.matmul %0, %1, %cst {dimension_numbers = #tpu.dot_dimension_numbers<[1], [0], [0], [1], [0, 0, 1, 1], [], []>} : vector<8x32xf32>, vector<32x128xf32>, vector<8x128xf32> -> vector<8x128xf32>
    %3 = arith.mulf %0, %0 : vector<8x32xf32>
    %cst_3 = arith.constant dense<0.000000e+00> : vector<8xf32>
    %4 = vector.multi_reduction <add>, %3, %cst_3 [1] : vector<8x32xf32> to vector<8xf32>
    %5 = vector.shape_cast %4 : vector<8xf32> to vector<8x1xf32>
    %c0_4 = arith.constant 0 : index
    %c0_5 = arith.constant 0 : index
    %6 = vector.load %arg3[%c0_4, %c0_5] : memref<1x128xf32, #tpu.memory_space<vmem>>, vector<1x128xf32>
    %7 = vector.broadcast %5 : vector<8x1xf32> to vector<8x128xf32>
    %8 = vector.broadcast %6 : vector<1x128xf32> to vector<8x128xf32>
    %9 = arith.addf %7, %8 : vector<8x128xf32>
    %cst_6 = arith.constant 2.000000e+00 : f32
    %10 = vector.broadcast %cst_6 : f32 to vector<8x128xf32>
    %11 = arith.mulf %10, %2 : vector<8x128xf32>
    %12 = arith.subf %9, %11 : vector<8x128xf32>
    %cst_7 = arith.constant 0.000000e+00 : f32
    %13 = vector.broadcast %cst_7 : f32 to vector<8x128xf32>
    %14 = arith.maximumf %12, %13 : vector<8x128xf32>
    %cst_8 = arith.constant 1.000000e+00 : f32
    %15 = vector.broadcast %cst_8 : f32 to vector<8x128xf32>
    %16 = arith.mulf %14, %15 : vector<8x128xf32>
    %cst_9 = arith.constant 1.000000e+00 : f32
    %17 = vector.broadcast %cst_9 : f32 to vector<8x128xf32>
    %18 = arith.addf %17, %16 : vector<8x128xf32>
    %19 = tpu.reciprocal %18 {approx = true} : vector<8x128xf32> -> vector<8x128xf32>
    %20 = arith.mulf %18, %19 : vector<8x128xf32>
    %cst_10 = arith.constant 2.000000e+00 : f32
    %21 = vector.broadcast %cst_10 : f32 to vector<8x128xf32>
    %22 = arith.subf %21, %20 : vector<8x128xf32>
    %23 = arith.mulf %19, %22 : vector<8x128xf32>
    %cst_11 = arith.constant dense<0.000000e+00> : vector<8xf32>
    %24 = vector.multi_reduction <add>, %23, %cst_11 [1] : vector<8x128xf32> to vector<8xf32>
    %25 = vector.shape_cast %24 : vector<8xf32> to vector<8x1xf32>
    %26 = tpu.reciprocal %25 {approx = true} : vector<8x1xf32> -> vector<8x1xf32>
    %27 = arith.mulf %25, %26 : vector<8x1xf32>
    %cst_12 = arith.constant 2.000000e+00 : f32
    %28 = vector.broadcast %cst_12 : f32 to vector<8x1xf32>
    %29 = arith.subf %28, %27 : vector<8x1xf32>
    %30 = arith.mulf %26, %29 : vector<8x1xf32>
    %31 = vector.broadcast %30 : vector<8x1xf32> to vector<8x128xf32>
    %32 = arith.mulf %23, %31 : vector<8x128xf32>
    %c0_13 = arith.constant 0 : index
    %c0_14 = arith.constant 0 : index
    %33 = vector.load %arg4[%c0_13, %c0_14] : memref<8x128xf32, #tpu.memory_space<vmem>>, vector<8x128xf32>
    tpu.vector_store %arg4[%c0_13, %c0_14], %32 {strides = array<i32>} : memref<8x128xf32, #tpu.memory_space<vmem>>, vector<8x128xf32>,
    return
  }
  func.func @transform_0(%arg0: i32) -> (i32, i32) {
    %c0_i32 = arith.constant 0 : i32
    %c0_i32_0 = arith.constant 0 : i32
    return %arg0, %c0_i32 : i32, i32
  }
  func.func @transform_1(%arg0: i32) -> (i32, i32) {
    %c0_i32 = arith.constant 0 : i32
    %c0_i32_0 = arith.constant 0 : i32
    %c0_i32_1 = arith.constant 0 : i32
    return %c0_i32, %c0_i32_0 : i32, i32
  }
  func.func @transform_2(%arg0: i32) -> (i32, i32) {
    %c0_i32 = arith.constant 0 : i32
    %c0_i32_0 = arith.constant 0 : i32
    %c0_i32_1 = arith.constant 0 : i32
    return %c0_i32, %c0_i32_0 : i32, i32
  }
  func.func @transform_3(%arg0: i32) -> (i32, i32) {
    %c0_i32 = arith.constant 0 : i32
    %c0_i32_0 = arith.constant 0 : i32
    return %arg0, %c0_i32 : i32, i32
  }
}

module attributes {stable_mosaic.version = 11 : i64} {
  func.func @_clustering_kernel(%arg0: i32, %arg1: memref<8x32xf32, #tpu.memory_space<vmem>>, %arg2: memref<32x128xf32, #tpu.memory_space<vmem>>, %arg3: memref<1x128xf32, #tpu.memory_space<vmem>>, %arg4: memref<8x128xf32, #tpu.memory_space<vmem>>) attributes {dimension_semantics = [#tpu.dimension_semantics<parallel>], iteration_bounds = array<i64: 1>, scalar_prefetch = 0 : i64, scratch_operands = 0 : i64, tpu.core_type = #tpu.core_type<tc>, window_params = [{transform_indices = @transform_0, window_bounds = array<i64: 8, 32>}, {pipeline_mode = #tpu.pipeline_mode<synchronous>, transform_indices = @transform_1, window_bounds = array<i64: 32, 128>}, {pipeline_mode = #tpu.pipeline_mode<synchronous>, transform_indices = @transform_2, window_bounds = array<i64: 1, 128>}, {transform_indices = @transform_3, window_bounds = array<i64: 8, 128>}]} {
    %c0 = arith.constant 0 : index
    %c0_0 = arith.constant 0 : index
    %0 = vector.load %arg1[%c0, %c0_0] : memref<8x32xf32, #tpu.memory_space<vmem>>, vector<8x32xf32>
    %c0_1 = arith.constant 0 : index
    %c0_2 = arith.constant 0 : index
    %1 = vector.load %arg2[%c0_1, %c0_2] : memref<32x128xf32, #tpu.memory_space<vmem>>, vector<32x128xf32>
    %cst = arith.constant dense<0.000000e+00> : vector<8x128xf32>
    %2 = tpu.matmul %0, %1, %cst {dimension_numbers = #tpu.dot_dimension_numbers<[1], [0], [0], [1], [0, 0, 1, 1], [], []>} : vector<8x32xf32>, vector<32x128xf32>, vector<8x128xf32> -> vector<8x128xf32>
    %3 = arith.mulf %0, %0 : vector<8x32xf32>
    %cst_3 = arith.constant dense<0.000000e+00> : vector<8xf32>
    %4 = vector.multi_reduction <add>, %3, %cst_3 [1] : vector<8x32xf32> to vector<8xf32>
    %5 = vector.shape_cast %4 : vector<8xf32> to vector<8x1xf32>
    %c0_4 = arith.constant 0 : index
    %c0_5 = arith.constant 0 : index
    %6 = vector.load %arg3[%c0_4, %c0_5] : memref<1x128xf32, #tpu.memory_space<vmem>>, vector<1x128xf32>
    %7 = vector.broadcast %5 : vector<8x1xf32> to vector<8x128xf32>
    %8 = vector.broadcast %6 : vector<1x128xf32> to vector<8x128xf32>
    %9 = arith.addf %7, %8 : vector<8x128xf32>
    %cst_6 = arith.constant 2.000000e+00 : f32
    %10 = vector.broadcast %cst_6 : f32 to vector<8x128xf32>
    %11 = arith.mulf %10, %2 : vector<8x128xf32>
    %12 = arith.subf %9, %11 : vector<8x128xf32>
    %cst_7 = arith.constant 0.000000e+00 : f32
    %13 = vector.broadcast %cst_7 : f32 to vector<8x128xf32>
    %14 = arith.maximumf %12, %13 : vector<8x128xf32>
    %cst_8 = arith.constant 1.000000e+00 : f32
    %15 = vector.broadcast %cst_8 : f32 to vector<8x128xf32>
    %16 = arith.mulf %14, %15 : vector<8x128xf32>
    %cst_9 = arith.constant 1.000000e+00 : f32
    %17 = vector.broadcast %cst_9 : f32 to vector<8x128xf32>
    %18 = arith.addf %17, %16 : vector<8x128xf32>
    %19 = tpu.reciprocal %18 {approx = true} : vector<8x128xf32> -> vector<8x128xf32>
    %20 = arith.mulf %18, %19 : vector<8x128xf32>
    %cst_10 = arith.constant 2.000000e+00 : f32
    %21 = vector.broadcast %cst_10 : f32 to vector<8x128xf32>
    %22 = arith.subf %21, %20 : vector<8x128xf32>
    %23 = arith.mulf %19, %22 : vector<8x128xf32>
    %cst_11 = arith.constant dense<0.000000e+00> : vector<8xf32>
    %24 = vector.multi_reduction <add>, %23, %cst_11 [1] : vector<8x128xf32> to vector<8xf32>
    %25 = vector.shape_cast %24 : vector<8xf32> to vector<8x1xf32>
    %26 = tpu.reciprocal %25 {approx = true} : vector<8x1xf32> -> vector<8x1xf32>
    %27 = arith.mulf %25, %26 : vector<8x1xf32>
    %cst_12 = arith.constant 2.000000e+00 : f32
    %28 = vector.broadcast %cst_12 : f32 to vector<8x1xf32>
    %29 = arith.subf %28, %27 : vector<8x1xf32>
    %30 = arith.mulf %26, %29 : vector<8x1xf32>
    %31 = vector.broadcast %30 : vector<8x1xf32> to vector<8x128xf32>
    %32 = arith.mulf %23, %31 : vector<8x128xf32>
    %c0_13 = arith.constant 0 : index
    %c0_14 = arith.constant 0 : index
    %33 = vector.load %arg4[%c0_13, %c0_14] : memref<8x128xf32, #tpu.memory_space<vmem>>, vector<8x128xf32>
    tpu.vector_store %arg4[%c0_13, %c0_14], %32 {strides = array<i32>} : memref<8x128xf32, #tpu.memory_space<vmem>>, vector<8x128xf32>,
    return
  }
  func.func @transform_0(%arg0: i32) -> (i32, i32) {
    %c0_i32 = arith.constant 0 : i32
    %c0_i32_0 = arith.constant 0 : i32
    return %arg0, %c0_i32 : i32, i32
  }
  func.func @transform_1(%arg0: i32) -> (i32, i32) {
    %c0_i32 = arith.constant 0 : i32
    %c0_i32_0 = arith.constant 0 : i32
    %c0_i32_1 = arith.constant 0 : i32
    return %c0_i32, %c0_i32_0 : i32, i32
  }
  func.func @transform_2(%arg0: i32) -> (i32, i32) {
    %c0_i32 = arith.constant 0 : i32
    %c0_i32_0 = arith.constant 0 : i32
    %c0_i32_1 = arith.constant 0 : i32
    return %c0_i32, %c0_i32_0 : i32, i32
  }
  func.func @transform_3(%arg0: i32) -> (i32, i32) {
    %c0_i32 = arith.constant 0 : i32
    %c0_i32_0 = arith.constant 0 : i32
    return %arg0, %c0_i32 : i32, i32
  }
}

</mosaic_0001>

<bundles_post_ra>
// kernel: tpu_custom_call.1
= control target key start
LH: loop header
LB: loop body
LE: loop exit
PB: predicated region body
PF: predicated region fallthrough
CT: control target
= control target key end

     0   :  { %8 = vsyncpa [#allocation3], 0  ;;  %s243_s0 = inlined_call_operand.hbm [shape: f32[8,32], index: 0, kind: input, shape index: {}]   ;;  %s244_s1 = inlined_call_operand.hbm [shape: f32[32,128], index: 1, kind: input, shape index: {}]   ;;  %s245_s2 = inlined_call_operand.vmem [shape: f32[1,128], index: 2, kind: input, shape index: {}]   ;;  %s246_s3 = inlined_call_operand.hbm [shape: f32[8,128], index: 3, kind: output, shape index: {}]  }
   0x1   :  { %9 = vsyncpa [#allocation6], 0 }
   0x2   :  { %10 = vsyncpa [#allocation4], 0  ;;  %s16_s14 = sshll.u32 %s243_s0, 4  ;;  %s206_s15 = smov [#allocation2]   ;;  %s17_s14 = int_to_ptr.hbm [resolvable:$true] %s16_s14 }
   0x3   :  { %s18_s16 = sshll.u32 %s206_s15, 4  ;;  %s26_s19 = sshll.u32 %s244_s1, 4  ;;  %s19_s16 = int_to_ptr.vmem [resolvable:$true] %s18_s16  ;;  %s27_s19 = int_to_ptr.hbm [resolvable:$true] %s26_s19 }
   0x4   :  { %21 = dma.hbm_to_vmem [thread:$0]  %s17_s14, 128, %s19_s16, [#allocation3]  }
   0x5   :  { %s207_s20 = smov [#allocation5]   ;;  %s208_s22 = smov 128  }
   0x6   :  { %s28_s21 = sshll.u32 %s207_s20, 4  ;;  %s209_s23 = smov 8   ;;  %s29_s21 = int_to_ptr.vmem [resolvable:$true] %s28_s21 }
   0x7   :  { %34 = dma.hbm_to_vmem [thread:$0]  %s27_s19, 512, %s29_s21, [#allocation6], %s208_s22, %s208_s22, %s209_s23  }
   0x8   :  { %200 = dma.done.wait [#allocation3], 128  }
   0x9   :  { %201 = vsyncadd [#allocation3], 4294967168 }
   0xa   :  { %202 = dma.done.wait [#allocation6], 512  }
   0xb   :  { %203 = vsyncadd [#allocation6], 4294966784  ;;  %v49_v0 = vld [vmem:[#allocation5 + $0x18] sm:$0xff]  ;;  %v48_v1 = vld [vmem:[#allocation5 + $0x10] sm:$0xff]  ;;  %vm50_vm0 = vcmask 261120   ;;  %s210_s24 = smov [#allocation7]  }
   0xc   :  { %66 = vmatpush.msra.mxu0 %v49_v0  ;;  %v45_v2 = vld [vmem:[#allocation2] sm:$0xff]  ;;  %v47_v3 = vld [vmem:[#allocation5 + $0x8] sm:$0xff]  ;;  %v46_v5 = vld [vmem:[#allocation5] sm:$0xff]  ;;  %s106_s27 = sshll.u32 %s246_s3, 4  ;;  %s107_s27 = int_to_ptr.hbm [resolvable:$true] %s106_s27 }
   0xd   :  { %v74_v4 = vmul.f32 %v45_v2, %v45_v2  ;;  %v123_v7 = vld [vmem:[%s245_s2] ss:$0 sm:$0xff]  ;;  %s104_s2 = sshll.u32 %s210_s24, 4  ;;  %s105_s2 = int_to_ptr.vmem [resolvable:$true] %s104_s2 }
   0xe   :  { %67 = vmatpush.msra.mxu0 %v48_v1 }
   0xf   :  { %v75_v6 = vsel %vm50_vm0, %v74_v4, 0.0 }
  0x10   :  { %68 = vmatpush.msra.mxu0 %v47_v3  ;;  %76 = vadd.xlane.f32.xlu0 %v75_v6 }
  0x12   :  { %69 = vmatpush.msra.mxu0 %v46_v5 }
  0x13   :  { %117 = vmatmul.msk.f32.vlgmr.msra.gmra.mxu0 %vm50_vm0, %v45_v2 }
  0x83   :  { %v77_v8 = vpop.xlane.xlu0 %76 }
  0x84   :  { %v82_v9 = vadd.f32 %v123_v7, %v77_v8 }
  0x90   :  { %v71_v10 = vpop.f32.mrf.mxu0 }
  0x91   :  { %v83_v11 = vmul.f32 2.0, %v71_v10 }
  0x93   :  { %v84_v12 = vsub.f32 %v82_v9, %v83_v11 }
  0x95   :  { %v85_v13 = vmax.f32 %v84_v12, 0.0 }
  0x97   :  { %v86_v14 = vadd.f32 1.0, %v85_v13 }
  0x99   :  { %124 = vrcp.f32 %v86_v14 }
  0x9f   :  { %v125_v15 = vpop.eup %124 }
  0xa0   :  { %v88_v16 = vmul.f32 %v125_v15, %v86_v14 }
  0xa2   :  { %v89_v17 = vsub.f32 2.0, %v88_v16 }
  0xa4   :  { %v90_v18 = vmul.f32 %v125_v15, %v89_v17 }
  0xa6   :  { %91 = vadd.xlane.f32.xlu0 %v90_v18 }
 0x119   :  { %v92_v19 = vpop.xlane.xlu0 %91 }
 0x11a   :  { %126 = vrcp.f32 %v92_v19 }
 0x120   :  { %v127_v20 = vpop.eup %126 }
 0x121   :  { %v94_v21 = vmul.f32 %v127_v20, %v92_v19 }
 0x123   :  { %v95_v22 = vsub.f32 2.0, %v94_v21 }
 0x125   :  { %v96_v23 = vmul.f32 %v127_v20, %v95_v22 }
 0x127   :  { %v97_v24 = vmul.f32 %v96_v23, %v90_v18 }
 0x129   :  { %98 = vst [vmem:[#allocation7] sm:$0xff] %v97_v24 }
 0x12a   :  { %109 = dma.vmem_to_hbm [thread:$0]  %s105_s2, 128, %s107_s27, [#allocation4]  }
 0x12b   :  { %204 = dma.done.wait [#allocation4], 128  }
 0x12c   :  { %205 = vsyncadd [#allocation4], 4294967168 }
 0x12d   :  { %114 = vsyncpa [#allocation3], 1 }
 0x12e   :  { %115 = vsyncpa [#allocation6], 1 }
 0x12f   :  { %116 = vsyncpa [#allocation4], 1 }

// kernel: tpu_custom_call.1
= control target key start
LH: loop header
LB: loop body
LE: loop exit
PB: predicated region body
PF: predicated region fallthrough
CT: control target
= control target key end

     0   :  { %8 = vsyncpa [#allocation3], 0  ;;  %s243_s0 = inlined_call_operand.hbm [shape: f32[8,32], index: 0, kind: input, shape index: {}]   ;;  %s244_s1 = inlined_call_operand.hbm [shape: f32[32,128], index: 1, kind: input, shape index: {}]   ;;  %s245_s2 = inlined_call_operand.vmem [shape: f32[1,128], index: 2, kind: input, shape index: {}]   ;;  %s246_s3 = inlined_call_operand.hbm [shape: f32[8,128], index: 3, kind: output, shape index: {}]  }
   0x1   :  { %9 = vsyncpa [#allocation6], 0 }
   0x2   :  { %10 = vsyncpa [#allocation4], 0  ;;  %s16_s14 = sshll.u32 %s243_s0, 4  ;;  %s206_s15 = smov [#allocation2]   ;;  %s17_s14 = int_to_ptr.hbm [resolvable:$true] %s16_s14 }
   0x3   :  { %s18_s16 = sshll.u32 %s206_s15, 4  ;;  %s26_s19 = sshll.u32 %s244_s1, 4  ;;  %s19_s16 = int_to_ptr.vmem [resolvable:$true] %s18_s16  ;;  %s27_s19 = int_to_ptr.hbm [resolvable:$true] %s26_s19 }
   0x4   :  { %21 = dma.hbm_to_vmem [thread:$0]  %s17_s14, 128, %s19_s16, [#allocation3]  }
   0x5   :  { %s207_s20 = smov [#allocation5]   ;;  %s208_s22 = smov 128  }
   0x6   :  { %s28_s21 = sshll.u32 %s207_s20, 4  ;;  %s209_s23 = smov 8   ;;  %s29_s21 = int_to_ptr.vmem [resolvable:$true] %s28_s21 }
   0x7   :  { %34 = dma.hbm_to_vmem [thread:$0]  %s27_s19, 512, %s29_s21, [#allocation6], %s208_s22, %s208_s22, %s209_s23  }
   0x8   :  { %200 = dma.done.wait [#allocation3], 128  }
   0x9   :  { %201 = vsyncadd [#allocation3], 4294967168 }
   0xa   :  { %202 = dma.done.wait [#allocation6], 512  }
   0xb   :  { %203 = vsyncadd [#allocation6], 4294966784  ;;  %v49_v0 = vld [vmem:[#allocation5 + $0x18] sm:$0xff]  ;;  %v48_v1 = vld [vmem:[#allocation5 + $0x10] sm:$0xff]  ;;  %vm50_vm0 = vcmask 261120   ;;  %s210_s24 = smov [#allocation7]  }
   0xc   :  { %66 = vmatpush.msra.mxu0 %v49_v0  ;;  %v45_v2 = vld [vmem:[#allocation2] sm:$0xff]  ;;  %v47_v3 = vld [vmem:[#allocation5 + $0x8] sm:$0xff]  ;;  %v46_v5 = vld [vmem:[#allocation5] sm:$0xff]  ;;  %s106_s27 = sshll.u32 %s246_s3, 4  ;;  %s107_s27 = int_to_ptr.hbm [resolvable:$true] %s106_s27 }
   0xd   :  { %v74_v4 = vmul.f32 %v45_v2, %v45_v2  ;;  %v123_v7 = vld [vmem:[%s245_s2] ss:$0 sm:$0xff]  ;;  %s104_s2 = sshll.u32 %s210_s24, 4  ;;  %s105_s2 = int_to_ptr.vmem [resolvable:$true] %s104_s2 }
   0xe   :  { %67 = vmatpush.msra.mxu0 %v48_v1 }
   0xf   :  { %v75_v6 = vsel %vm50_vm0, %v74_v4, 0.0 }
  0x10   :  { %68 = vmatpush.msra.mxu0 %v47_v3  ;;  %76 = vadd.xlane.f32.xlu0 %v75_v6 }
  0x12   :  { %69 = vmatpush.msra.mxu0 %v46_v5 }
  0x13   :  { %117 = vmatmul.msk.f32.vlgmr.msra.gmra.mxu0 %vm50_vm0, %v45_v2 }
  0x83   :  { %v77_v8 = vpop.xlane.xlu0 %76 }
  0x84   :  { %v82_v9 = vadd.f32 %v123_v7, %v77_v8 }
  0x90   :  { %v71_v10 = vpop.f32.mrf.mxu0 }
  0x91   :  { %v83_v11 = vmul.f32 2.0, %v71_v10 }
  0x93   :  { %v84_v12 = vsub.f32 %v82_v9, %v83_v11 }
  0x95   :  { %v85_v13 = vmax.f32 %v84_v12, 0.0 }
  0x97   :  { %v86_v14 = vadd.f32 1.0, %v85_v13 }
  0x99   :  { %124 = vrcp.f32 %v86_v14 }
  0x9f   :  { %v125_v15 = vpop.eup %124 }
  0xa0   :  { %v88_v16 = vmul.f32 %v125_v15, %v86_v14 }
  0xa2   :  { %v89_v17 = vsub.f32 2.0, %v88_v16 }
  0xa4   :  { %v90_v18 = vmul.f32 %v125_v15, %v89_v17 }
  0xa6   :  { %91 = vadd.xlane.f32.xlu0 %v90_v18 }
 0x119   :  { %v92_v19 = vpop.xlane.xlu0 %91 }
 0x11a   :  { %126 = vrcp.f32 %v92_v19 }
 0x120   :  { %v127_v20 = vpop.eup %126 }
 0x121   :  { %v94_v21 = vmul.f32 %v127_v20, %v92_v19 }
 0x123   :  { %v95_v22 = vsub.f32 2.0, %v94_v21 }
 0x125   :  { %v96_v23 = vmul.f32 %v127_v20, %v95_v22 }
 0x127   :  { %v97_v24 = vmul.f32 %v96_v23, %v90_v18 }
 0x129   :  { %98 = vst [vmem:[#allocation7] sm:$0xff] %v97_v24 }
 0x12a   :  { %109 = dma.vmem_to_hbm [thread:$0]  %s105_s2, 128, %s107_s27, [#allocation4]  }
 0x12b   :  { %204 = dma.done.wait [#allocation4], 128  }
 0x12c   :  { %205 = vsyncadd [#allocation4], 4294967168 }
 0x12d   :  { %114 = vsyncpa [#allocation3], 1 }
 0x12e   :  { %115 = vsyncpa [#allocation6], 1 }
 0x12f   :  { %116 = vsyncpa [#allocation4], 1 }

</bundles_post_ra>
